<compile_context>
chip_gen: v5e
topology: v5e:2x2
jax: 0.10.0
libtpu: 0.0.40
codegen_flags: <defaults>
</compile_context>

<pallas_src>
import math
import functools

import jax
import jax.numpy as jnp
from jax import lax
from jax.experimental import pallas as pl
from jax.experimental.pallas import tpu as pltpu


# ---------------------------------------------------------------------------
# helpers
# ---------------------------------------------------------------------------
def _pick_tile(n, target, *, mult=8):
    """Largest tile <= target that divides n and is a multiple of `mult`;
    falls back to the full extent n (always legal: block == full dim)."""
    if n <= target:
        return n
    t = (target // mult) * mult
    while t >= mult:
        if n % t == 0:
            return t
        t -= mult
    return n


# ---------------------------------------------------------------------------
# fused QKV projection:  (B*S, E) @ (E, 3H) -> (B*S, 3H) in bf16
# ---------------------------------------------------------------------------
def _qkv_proj_kernel(x_ref, w_ref, qkv_ref):
    qkv_ref[...] = jnp.dot(
        x_ref[...].astype(jnp.bfloat16),
        w_ref[...].astype(jnp.bfloat16),
        preferred_element_type=jnp.float32,
    ).astype(qkv_ref.dtype)


def _fused_qkv_projection(x2d, w_qkv):
    R, E = x2d.shape
    threeH = w_qkv.shape[1]
    tr = _pick_tile(R, 512, mult=8)
    return pl.pallas_call(
        _qkv_proj_kernel,
        out_shape=jax.ShapeDtypeStruct((R, threeH), jnp.bfloat16),
        grid_spec=pltpu.PrefetchScalarGridSpec(
            num_scalar_prefetch=0,
            grid=(R // tr,),
            in_specs=[
                pl.BlockSpec((tr, E), lambda r: (r, 0)),
                pl.BlockSpec((E, threeH), lambda r: (0, 0)),
            ],
            out_specs=pl.BlockSpec((tr, threeH), lambda r: (r, 0)),
        ),
        compiler_params=pltpu.CompilerParams(dimension_semantics=("parallel",)),
    )(x2d, w_qkv)


# ---------------------------------------------------------------------------
# flash-style attention (no attention-matrix output), grid (B, Sq, Sk)
# ---------------------------------------------------------------------------
def _flash_attn_kernel(*refs, has_mask, scale):
    if has_mask:
        q_ref, k_ref, v_ref, mask_ref, o_ref, m_sc, l_sc, acc_sc = refs
    else:
        q_ref, k_ref, v_ref, o_ref, m_sc, l_sc, acc_sc = refs
        mask_ref = None

    ki = pl.program_id(2)

    @pl.when(ki == 0)
    def _():
        m_sc[...] = jnp.full_like(m_sc, -1e30)
        l_sc[...] = jnp.zeros_like(l_sc)
        acc_sc[...] = jnp.zeros_like(acc_sc)

    q = q_ref[...].astype(jnp.bfloat16)            # (tq, H)
    k = k_ref[...].astype(jnp.bfloat16)            # (tk, H)
    # q @ k^T without an explicit transpose
    s = lax.dot_general(
        q, k, dimension_numbers=(((1,), (1,)), ((), ())),
        preferred_element_type=jnp.float32,
    ) * scale                                      # (tq, tk) f32
    if has_mask:
        s = jnp.where(mask_ref[...] == 0, -1e30, s)

    m_prev = m_sc[...]
    m_new = jnp.maximum(m_prev, jnp.max(s, axis=-1, keepdims=True))
    alpha = jnp.exp(m_prev - m_new)
    p = jnp.exp(s - m_new)                         # (tq, tk)
    l_sc[...] = alpha * l_sc[...] + jnp.sum(p, axis=-1, keepdims=True)
    acc_sc[...] = alpha * acc_sc[...] + jnp.dot(
        p.astype(jnp.bfloat16), v_ref[...].astype(jnp.bfloat16),
        preferred_element_type=jnp.float32,
    )
    m_sc[...] = m_new

    @pl.when(ki == pl.num_programs(2) - 1)
    def _():
        inv_l = pl.reciprocal(l_sc[...], approx=True)
        o_ref[...] = (acc_sc[...] * inv_l).astype(o_ref.dtype)


def _flash_attention(q, k, v, mask8, scale):
    B, S, H = q.shape
    tq = _pick_tile(S, 256, mult=8)
    # kv tile is the lane dim of the mask block -> multiple of 128 (or full S)
    tk = _pick_tile(S, 256, mult=128)
    has_mask = mask8 is not None

    kernel = functools.partial(_flash_attn_kernel, has_mask=has_mask, scale=scale)

    in_specs = [
        pl.BlockSpec((pl.Squeezed(), tq, H), lambda b, qi, ki: (b, qi, 0)),
        pl.BlockSpec((pl.Squeezed(), tk, H), lambda b, qi, ki: (b, ki, 0)),
        pl.BlockSpec((pl.Squeezed(), tk, H), lambda b, qi, ki: (b, ki, 0)),
    ]
    args = [q, k, v]
    if has_mask:
        in_specs.append(
            pl.BlockSpec((pl.Squeezed(), tq, tk), lambda b, qi, ki: (b, qi, ki)))
        args.append(mask8)

    return pl.pallas_call(
        kernel,
        out_shape=jax.ShapeDtypeStruct((B, S, H), jnp.float32),
        grid_spec=pltpu.PrefetchScalarGridSpec(
            num_scalar_prefetch=0,
            grid=(B, S // tq, S // tk),
            in_specs=in_specs,
            out_specs=pl.BlockSpec((pl.Squeezed(), tq, H),
                                   lambda b, qi, ki: (b, qi, 0)),
            scratch_shapes=[
                pltpu.VMEM((tq, 1), jnp.float32),   # running max m
                pltpu.VMEM((tq, 1), jnp.float32),   # running denom l
                pltpu.VMEM((tq, H), jnp.float32),   # output accumulator
            ],
        ),
        compiler_params=pltpu.CompilerParams(
            dimension_semantics=("parallel", "parallel", "arbitrary")),
    )(*args)


# ---------------------------------------------------------------------------
# attention with probabilities output (output_attentions=True), grid (B, Sq)
# ---------------------------------------------------------------------------
def _attn_probs_kernel(*refs, has_mask, scale):
    if has_mask:
        q_ref, k_ref, v_ref, mask_ref, o_ref, attn_ref = refs
    else:
        q_ref, k_ref, v_ref, o_ref, attn_ref = refs
        mask_ref = None

    q = q_ref[...].astype(jnp.bfloat16)            # (tq, H)
    k = k_ref[...].astype(jnp.bfloat16)            # (S, H)
    s = lax.dot_general(
        q, k, dimension_numbers=(((1,), (1,)), ((), ())),
        preferred_element_type=jnp.float32,
    ) * scale                                      # (tq, S)
    if has_mask:
        s = jnp.where(mask_ref[...] == 0, -1e30, s)

    m = jnp.max(s, axis=-1, keepdims=True)
    e = jnp.exp(s - m)
    attn = e * pl.reciprocal(jnp.sum(e, axis=-1, keepdims=True), approx=True)

    o_ref[...] = jnp.dot(
        attn.astype(jnp.bfloat16), v_ref[...].astype(jnp.bfloat16),
        preferred_element_type=jnp.float32,
    ).astype(o_ref.dtype)
    attn_ref[...] = attn.astype(attn_ref.dtype)


def _attention_with_probs(q, k, v, mask8, scale):
    B, S, H = q.shape
    # keep the (tq, S) f32 score/attention tile bounded (~8 MiB)
    tq_target = max(8, min(256, (2 * 1024 * 1024) // max(S, 1)))
    tq = _pick_tile(S, tq_target, mult=8)
    has_mask = mask8 is not None

    kernel = functools.partial(_attn_probs_kernel, has_mask=has_mask, scale=scale)

    in_specs = [
        pl.BlockSpec((pl.Squeezed(), tq, H), lambda b, qi: (b, qi, 0)),
        pl.BlockSpec((pl.Squeezed(), S, H), lambda b, qi: (b, 0, 0)),
        pl.BlockSpec((pl.Squeezed(), S, H), lambda b, qi: (b, 0, 0)),
    ]
    args = [q, k, v]
    if has_mask:
        in_specs.append(
            pl.BlockSpec((pl.Squeezed(), tq, S), lambda b, qi: (b, qi, 0)))
        args.append(mask8)

    return pl.pallas_call(
        kernel,
        out_shape=(
            jax.ShapeDtypeStruct((B, S, H), jnp.float32),
            jax.ShapeDtypeStruct((B, S, S), jnp.float32),
        ),
        grid_spec=pltpu.PrefetchScalarGridSpec(
            num_scalar_prefetch=0,
            grid=(B, S // tq),
            in_specs=in_specs,
            out_specs=[
                pl.BlockSpec((pl.Squeezed(), tq, H), lambda b, qi: (b, qi, 0)),
                pl.BlockSpec((pl.Squeezed(), tq, S), lambda b, qi: (b, qi, 0)),
            ],
        ),
        compiler_params=pltpu.CompilerParams(
            dimension_semantics=("parallel", "parallel")),
    )(*args)


# ---------------------------------------------------------------------------
# public wrapper matching AttentionHead.forward
# ---------------------------------------------------------------------------
def attention_head(x, Qw, Kw, Vw, attention_mask=None, output_attentions=False):
    """x: (B, S, E) f32; Qw/Kw/Vw: (E, H) f32; attention_mask: (B, S, S) or None."""
    B, S, E = x.shape
    H = Qw.shape[1]
    scale = 1.0 / math.sqrt(H)

    # fused projection: one (E, 3H) matmul instead of three (E, H) ones
    w_qkv = jnp.concatenate([Qw, Kw, Vw], axis=1)              # (E, 3H)
    qkv = _fused_qkv_projection(x.reshape(B * S, E), w_qkv)    # (B*S, 3H) bf16
    qkv = qkv.reshape(B, S, 3 * H)
    q, k, v = qkv[..., :H], qkv[..., H:2 * H], qkv[..., 2 * H:]

    mask8 = None
    if attention_mask is not None:
        mask8 = attention_mask.astype(jnp.int8)                # 1 byte/elem DMA

    if output_attentions:
        states, attn = _attention_with_probs(q, k, v, mask8, scale)
        return states, attn
    states = _flash_attention(q, k, v, mask8, scale)
    return states, None


# ---------------------------------------------------------------------------
# pure-JAX reference + self-test
# ---------------------------------------------------------------------------
def _reference(x, Qw, Kw, Vw, mask):
    scale = 1.0 / math.sqrt(Qw.shape[1])
    q = x @ Qw
    k = x @ Kw
    v = x @ Vw
    w = jnp.einsum("bqh,bkh->bqk", q, k) * scale
    if mask is not None:
        w = jnp.where(mask == 0, -jnp.inf, w)
    attn = jax.nn.softmax(w, axis=-1)
    return attn @ v, attn


if __name__ == "__main__":
    B, S, E, H = 2, 8, 32, 16
    key = jax.random.PRNGKey(0)
    kx, kq, kk, kv = jax.random.split(key, 4)

    x = jax.random.normal(kx, (B, S, E), dtype=jnp.float32)
    Qw = jax.random.normal(kq, (E, H), dtype=jnp.float32) * 0.01
    Kw = jax.random.normal(kk, (E, H), dtype=jnp.float32) * 0.01
    Vw = jax.random.normal(kv, (E, H), dtype=jnp.float32) * 0.01

    # causal mask (1 = attend, 0 = masked), broadcast over batch
    causal = jnp.tril(jnp.ones((S, S), dtype=jnp.int32))
    mask = jnp.broadcast_to(causal, (B, S, S))

    # path 1: output_attentions=True (query-tiled kernel with probs output)
    states, attn = attention_head(x, Qw, Kw, Vw, mask, output_attentions=True)
    # path 2: output_attentions=False (flash kernel, no S x S writeback)
    states_fast, attn_none = attention_head(x, Qw, Kw, Vw, mask,
                                            output_attentions=False)
    # path 3: no mask
    states_nomask, _ = attention_head(x, Qw, Kw, Vw, None,
                                      output_attentions=False)
    jax.block_until_ready((states, attn, states_fast, states_nomask))

    ref_states, ref_attn = _reference(x, Qw, Kw, Vw, mask)
    ref_states_nm, _ = _reference(x, Qw, Kw, Vw, None)

    # bf16 MXU operands + approx reciprocal -> relaxed tolerance vs f32 reference
    atol, rtol = 5e-3, 5e-2
    assert attn_none is None
    assert jnp.allclose(states, ref_states, atol=atol, rtol=rtol)
    assert jnp.allclose(attn, ref_attn, atol=atol, rtol=rtol)
    assert jnp.allclose(states_fast, ref_states, atol=atol, rtol=rtol)
    assert jnp.allclose(states_nomask, ref_states_nm, atol=atol, rtol=rtol)

    print("KERNEL_OK")
</pallas_src>

<mosaic_0001>
module attributes {stable_mosaic.version = 11 : i64} {
  func.func @_qkv_proj_kernel(%arg0: i32, %arg1: memref<16x32xf32, #tpu.memory_space<vmem>>, %arg2: memref<32x48xf32, #tpu.memory_space<vmem>>, %arg3: memref<16x48xbf16, #tpu.memory_space<vmem>>) attributes {dimension_semantics = [#tpu.dimension_semantics<parallel>], iteration_bounds = array<i64: 1>, scalar_prefetch = 0 : i64, scratch_operands = 0 : i64, tpu.core_type = #tpu.core_type<tc>, window_params = [{transform_indices = @transform_0, window_bounds = array<i64: 16, 32>}, {pipeline_mode = #tpu.pipeline_mode<synchronous>, transform_indices = @transform_1, window_bounds = array<i64: 32, 48>}, {transform_indices = @transform_2, window_bounds = array<i64: 16, 48>}]} {
    %c0 = arith.constant 0 : index
    %c0_0 = arith.constant 0 : index
    %0 = vector.load %arg1[%c0, %c0_0] : memref<16x32xf32, #tpu.memory_space<vmem>>, vector<16x32xf32>
    %1 = arith.truncf %0 : vector<16x32xf32> to vector<16x32xbf16>
    %c0_1 = arith.constant 0 : index
    %c0_2 = arith.constant 0 : index
    %2 = vector.load %arg2[%c0_1, %c0_2] : memref<32x48xf32, #tpu.memory_space<vmem>>, vector<32x48xf32>
    %3 = arith.truncf %2 : vector<32x48xf32> to vector<32x48xbf16>
    %cst = arith.constant dense<0.000000e+00> : vector<16x48xf32>
    %4 = tpu.matmul %1, %3, %cst {dimension_numbers = #tpu.dot_dimension_numbers<[1], [0], [0], [1], [0, 0, 1, 1], [], []>} : vector<16x32xbf16>, vector<32x48xbf16>, vector<16x48xf32> -> vector<16x48xf32>
    %5 = arith.truncf %4 : vector<16x48xf32> to vector<16x48xbf16>
    %c0_3 = arith.constant 0 : index
    %c0_4 = arith.constant 0 : index
    %6 = vector.load %arg3[%c0_3, %c0_4] : memref<16x48xbf16, #tpu.memory_space<vmem>>, vector<16x48xbf16>
    tpu.vector_store %arg3[%c0_3, %c0_4], %5 {strides = array<i32>} : memref<16x48xbf16, #tpu.memory_space<vmem>>, vector<16x48xbf16>,
    return
  }
  func.func @transform_0(%arg0: i32) -> (i32, i32) {
    %c0_i32 = arith.constant 0 : i32
    %c0_i32_0 = arith.constant 0 : i32
    return %arg0, %c0_i32 : i32, i32
  }
  func.func @transform_1(%arg0: i32) -> (i32, i32) {
    %c0_i32 = arith.constant 0 : i32
    %c0_i32_0 = arith.constant 0 : i32
    %c0_i32_1 = arith.constant 0 : i32
    return %c0_i32, %c0_i32_0 : i32, i32
  }
  func.func @transform_2(%arg0: i32) -> (i32, i32) {
    %c0_i32 = arith.constant 0 : i32
    %c0_i32_0 = arith.constant 0 : i32
    return %arg0, %c0_i32 : i32, i32
  }
}

</mosaic_0001>

<bundles_post_ra>
// kernel: tpu_custom_call.1
= control target key start
LH: loop header
LB: loop body
LE: loop exit
PB: predicated region body
PF: predicated region fallthrough
CT: control target
= control target key end

     0   :  { %7 = vsyncpa [#allocation3], 0  ;;  %s214_s0 = inlined_call_operand.hbm [shape: f32[16,32], index: 0, kind: input, shape index: {}]   ;;  %s215_s1 = inlined_call_operand.hbm [shape: f32[32,48], index: 1, kind: input, shape index: {}]   ;;  %s216_s2 = inlined_call_operand.hbm [shape: bf16[16,48], index: 2, kind: output, shape index: {}]  }
   0x1   :  { %8 = vsyncpa [#allocation6], 0 }
   0x2   :  { %9 = vsyncpa [#allocation4], 0  ;;  %s14_s11 = sshll.u32 %s214_s0, 4  ;;  %s183_s12 = smov [#allocation2]   ;;  %s15_s11 = int_to_ptr.hbm [resolvable:$true] %s14_s11 }
   0x3   :  { %s16_s13 = sshll.u32 %s183_s12, 4  ;;  %s27_s16 = sshll.u32 %s215_s1, 4  ;;  %s17_s13 = int_to_ptr.vmem [resolvable:$true] %s16_s13  ;;  %s28_s16 = int_to_ptr.hbm [resolvable:$true] %s27_s16 }
   0x4   :  { %s184_s17 = smov 128   ;;  %s185_s18 = smov 8  }
   0x5   :  { %22 = dma.hbm_to_vmem [thread:$0]  %s15_s11, 256, %s17_s13, [#allocation3], %s184_s17, %s184_s17, %s185_s18  }
   0x6   :  { %s186_s19 = smov [#allocation5]  }
   0x7   :  { %s29_s20 = sshll.u32 %s186_s19, 4  ;;  %s30_s20 = int_to_ptr.vmem [resolvable:$true] %s29_s20 }
   0x8   :  { %35 = dma.hbm_to_vmem [thread:$0]  %s28_s16, 512, %s30_s20, [#allocation6], %s184_s17, %s184_s17, %s185_s18  }
   0x9   :  { %177 = dma.done.wait [#allocation3], 256  }
   0xa   :  { %178 = vsyncadd [#allocation3], 4294967040 }
   0xb   :  { %179 = dma.done.wait [#allocation6], 512  }
   0xc   :  { %180 = vsyncadd [#allocation6], 4294966784  ;;  %v50_v0 = vld [vmem:[#allocation5 + $0x10] sm:$0xff]  ;;  %v51_v1 = vld [vmem:[#allocation5 + $0x18] sm:$0xff]  ;;  %vm54_vm0 = vcmask 261120   ;;  %vm74_vm1 = vcmask 388096  }
   0xd   :  { %v48_v2 = vld [vmem:[#allocation5] sm:$0xff]  ;;  %v53_v3 = vpack.c.bf16 %v51_v1, %v50_v0  ;;  %v49_v4 = vld [vmem:[#allocation5 + $0x8] sm:$0xff]  ;;  %v45_v6 = vld [vmem:[#allocation2] sm:$0xff]  ;;  %s187_s0 = smov [#allocation7]   ;;  %s83_s23 = sshll.u32 %s216_s2, 4  ;;  %s84_s23 = int_to_ptr.hbm [resolvable:$true] %s83_s23 }
   0xe   :  { %v52_v5 = vpack.c.bf16 %v49_v4, %v48_v2  ;;  %v46_v7 = vld [vmem:[#allocation2 + $0x8] sm:$0xff]  ;;  %s81_s1 = sshll.u32 %s187_s0, 4  ;;  %s188_s24 = smov 64   ;;  %s82_s1 = int_to_ptr.vmem [resolvable:$true] %s81_s1 }
   0xf   :  { %64 = vmatpush.bf16.msra.mxu0 %v53_v3  ;;  %v47_v8 = vpack.c.bf16 %v46_v7, %v45_v6  ;;  %s189_s25 = smov 4  }
  0x13   :  { %65 = vmatpush.bf16.msra.mxu0 %v52_v5 }
  0x16   :  { %97 = vmatmul.msk.bf16.vlgmr.msra.gmra.mxu0 %vm54_vm0, %v47_v8 }
  0x93   :  { %v67_v9 = vpop.f32.mrf.mxu0 }
  0x94   :  { %v72_v10 = vpack.c.bf16 %v67_v9, %v67_v9 }
  0x96   :  { %75 = vst.msk [vmem:[#allocation7] sm:$0xf] %vm74_vm1, %v72_v10 }
  0x9b   :  { %v69_v11 = vpop.f32.mrf.mxu0 }
  0x9c   :  { %v73_v12 = vpack.c.bf16 %v69_v11, %v69_v11 }
  0x9e   :  { %76 = vst.msk [vmem:[#allocation7 + $0x4] sm:$0xf] %vm74_vm1, %v73_v12 }
  0x9f   :  { %89 = dma.vmem_to_hbm [thread:$0]  %s82_s1, 128, %s84_s23, [#allocation4], %s188_s24, %s188_s24, %s189_s25  }
  0xa0   :  { %181 = dma.done.wait [#allocation4], 128  }
  0xa1   :  { %182 = vsyncadd [#allocation4], 4294967168 }
  0xa2   :  { %94 = vsyncpa [#allocation3], 1 }
  0xa3   :  { %95 = vsyncpa [#allocation6], 1 }
  0xa4   :  { %96 = vsyncpa [#allocation4], 1 }

</bundles_post_ra>
